<compile_context>
chip_gen: v6e
topology: v6e:2x2x1
jax: 0.10.0
libtpu: 0.0.40
codegen_flags: <defaults>
</compile_context>

<pallas_src>
import jax
import jax.numpy as jnp
from jax.experimental import pallas as pl
from jax.experimental.pallas import tpu as pltpu

LANES = 128
SUBLANES = 8
TILE_R_MAX = 1024  # (1024, 128) f32 block = 512 KiB per input


def _make_focal_kernel(numel, gamma, tile_r, needs_mask):
    gamma = float(gamma)

    def kernel(x_ref, t_ref, acc_ref):
        i = pl.program_id(0)

        @pl.when(i == 0)
        def _():
            acc_ref[...] = jnp.zeros_like(acc_ref)

        x = x_ref[...].astype(jnp.float32)
        t = t_ref[...].astype(jnp.float32)

        # Fused, numerically stable focal-loss math (3 EUP transcendentals).
        # NOTE: the invprobs fusion reuses exp(-|x|) and is exact for binary
        # targets t in {0,1} (the intended use of this module); soft labels
        # would need exp(-|x*(2t-1)|) instead.
        e = jnp.exp(-jnp.abs(x))                       # EUP exp
        log1pe = jnp.log(1.0 + e)                      # EUP log
        bce = jnp.maximum(x, 0.0) - x * t + log1pe
        z = x * (t * 2.0 - 1.0)
        invprobs = -(jnp.maximum(z, 0.0) + log1pe)
        loss = jnp.exp(invprobs * gamma) * bce         # EUP exp

        if needs_mask:
            # In-kernel validity mask (replaces the old HBM mask array):
            # global flat index of each element of this block vs. true numel.
            row_ids = jax.lax.broadcasted_iota(jnp.int32, loss.shape, 0)
            lane_ids = jax.lax.broadcasted_iota(jnp.int32, loss.shape, 1)
            flat_idx = (i * tile_r + row_ids) * LANES + lane_ids
            loss = jnp.where(flat_idx < numel, loss, 0.0)

        # Fold the block to a (1, 128) lane-partial on VPU/XLU; the expensive
        # full cross-lane reduce happens once, outside the kernel.
        acc_ref[...] += jnp.sum(loss, axis=0, keepdims=True)

    return kernel


def focal_loss(inp, target, gamma=2.0):
    """Forward of FocalLoss(gamma): returns a scalar f32."""
    if inp.shape != target.shape:
        raise ValueError(
            "Target size ({}) must be the same as input size ({})".format(
                target.shape, inp.shape
            )
        )

    c = inp.shape[1]
    numel = inp.size
    # loss.sum(dim=1).mean() == total_sum / (numel / C)
    denom = numel // c

    # Keep the original HBM dtype (e.g. bf16 activations stay bf16); upcast
    # to f32 happens inside the kernel after the DMA.
    flat_x = inp.reshape(-1)
    flat_t = target.reshape(-1)

    # Pad only if needed so the slab is (rows, 128) with rows % 8 == 0.
    # Padded tail elements are masked out inside the kernel via iota.
    pad = (-numel) % (SUBLANES * LANES)
    if pad:
        flat_x = jnp.pad(flat_x, (0, pad))
        flat_t = jnp.pad(flat_t, (0, pad))

    rows = flat_x.size // LANES
    x2d = flat_x.reshape(rows, LANES)
    t2d = flat_t.reshape(rows, LANES)

    tile_r = min(TILE_R_MAX, rows)          # rows is a multiple of 8, so is tile_r
    grid = (pl.cdiv(rows, tile_r),)
    needs_mask = (pad != 0) or (rows % tile_r != 0)

    kernel = _make_focal_kernel(numel, gamma, tile_r, needs_mask)

    in_spec = pl.BlockSpec((tile_r, LANES), lambda i: (i, 0))
    # Output block index is constant across the reduction axis -> resident
    # accumulator, written back to HBM once at the end.
    out_spec = pl.BlockSpec((1, LANES), lambda i: (0, 0))

    partial = pl.pallas_call(
        kernel,
        out_shape=jax.ShapeDtypeStruct((1, LANES), jnp.float32),
        grid_spec=pltpu.PrefetchScalarGridSpec(
            num_scalar_prefetch=0,
            grid=grid,
            in_specs=[in_spec, in_spec],
            out_specs=out_spec,
        ),
        compiler_params=pltpu.CompilerParams(
            dimension_semantics=("arbitrary",),
        ),
    )(x2d, t2d)

    # TODO(synk): optional v7x megacore split (two per-core partials) skipped;
    # a single "arbitrary" reduction axis runs on one TensorCore.
    return jnp.sum(partial) / jnp.float32(denom)


def _focal_loss_ref(inp, target, gamma=2.0):
    """Pure-JAX reference mirroring the PyTorch forward exactly."""
    x = inp.astype(jnp.float32)
    t = target.astype(jnp.float32)
    max_val = jnp.maximum(-x, 0.0)
    loss = x - x * t + max_val + jnp.log(jnp.exp(-max_val) + jnp.exp(-x - max_val))
    invprobs = jax.nn.log_sigmoid(-x * (t * 2.0 - 1.0))
    loss = jnp.exp(invprobs * gamma) * loss
    return loss.sum(axis=1).mean()


if __name__ == "__main__":
    key = jax.random.PRNGKey(0)
    k1, k2 = jax.random.split(key)

    # Small NCHW-style shapes: batch=2, channels=4, spatial=16x16.
    shape = (2, 4, 16, 16)
    x = jax.random.normal(k1, shape, dtype=jnp.float32)
    # Binary targets in {0, 1}, same shape as input (as the module requires).
    tgt = jax.random.bernoulli(k2, p=0.5, shape=shape).astype(jnp.float32)

    out = focal_loss(x, tgt, gamma=2.0)
    out = jax.block_until_ready(out)

    ref = _focal_loss_ref(x, tgt, gamma=2.0)
    assert jnp.allclose(out, ref, rtol=1e-4, atol=1e-6), (out, ref)

    print("KERNEL_OK")
</pallas_src>

<mosaic_0001>
module attributes {stable_mosaic.version = 11 : i64} {
  func.func @kernel(%arg0: i32, %arg1: memref<16x128xf32, #tpu.memory_space<vmem>>, %arg2: memref<16x128xf32, #tpu.memory_space<vmem>>, %arg3: memref<1x128xf32, #tpu.memory_space<vmem>>) attributes {dimension_semantics = [#tpu.dimension_semantics<arbitrary>], iteration_bounds = array<i64: 1>, scalar_prefetch = 0 : i64, scratch_operands = 0 : i64, tpu.core_type = #tpu.core_type<tc>, window_params = [{transform_indices = @transform_0, window_bounds = array<i64: 16, 128>}, {transform_indices = @transform_1, window_bounds = array<i64: 16, 128>}, {pipeline_mode = #tpu.pipeline_mode<synchronous>, transform_indices = @transform_2, window_bounds = array<i64: 1, 128>}]} {
    %c0_i32 = arith.constant 0 : i32
    %0 = arith.cmpi eq, %arg0, %c0_i32 : i32
    %1 = arith.extui %0 : i1 to i32
    %c0_i32_0 = arith.constant 0 : i32
    %2 = arith.cmpi ne, %1, %c0_i32_0 : i32
    scf.if %2 {
      %cst_16 = arith.constant 0.000000e+00 : f32
      %36 = vector.broadcast %cst_16 : f32 to vector<1x128xf32>
      %c0_17 = arith.constant 0 : index
      %c0_18 = arith.constant 0 : index
      %37 = vector.load %arg3[%c0_17, %c0_18] : memref<1x128xf32, #tpu.memory_space<vmem>>, vector<1x128xf32>
      tpu.vector_store %arg3[%c0_17, %c0_18], %36 {strides = array<i32>} : memref<1x128xf32, #tpu.memory_space<vmem>>, vector<1x128xf32>,
    } else {
    }
    %c0 = arith.constant 0 : index
    %c0_1 = arith.constant 0 : index
    %3 = vector.load %arg1[%c0, %c0_1] : memref<16x128xf32, #tpu.memory_space<vmem>>, vector<16x128xf32>
    %c0_2 = arith.constant 0 : index
    %c0_3 = arith.constant 0 : index
    %4 = vector.load %arg2[%c0_2, %c0_3] : memref<16x128xf32, #tpu.memory_space<vmem>>, vector<16x128xf32>
    %5 = math.absf %3 : vector<16x128xf32>
    %cst = arith.constant 0.000000e+00 : f32
    %6 = vector.broadcast %cst : f32 to vector<16x128xf32>
    %7 = arith.subf %6, %5 : vector<16x128xf32>
    %8 = math.exp %7 : vector<16x128xf32>
    %cst_4 = arith.constant 1.000000e+00 : f32
    %9 = vector.broadcast %cst_4 : f32 to vector<16x128xf32>
    %10 = arith.addf %9, %8 : vector<16x128xf32>
    %11 = math.log %10 : vector<16x128xf32>
    %cst_5 = arith.constant 0.000000e+00 : f32
    %12 = vector.broadcast %cst_5 : f32 to vector<16x128xf32>
    %13 = arith.maximumf %3, %12 : vector<16x128xf32>
    %14 = arith.mulf %3, %4 : vector<16x128xf32>
    %15 = arith.subf %13, %14 : vector<16x128xf32>
    %16 = arith.addf %15, %11 : vector<16x128xf32>
    %cst_6 = arith.constant 2.000000e+00 : f32
    %17 = vector.broadcast %cst_6 : f32 to vector<16x128xf32>
    %18 = arith.mulf %4, %17 : vector<16x128xf32>
    %cst_7 = arith.constant 1.000000e+00 : f32
    %19 = vector.broadcast %cst_7 : f32 to vector<16x128xf32>
    %20 = arith.subf %18, %19 : vector<16x128xf32>
    %21 = arith.mulf %3, %20 : vector<16x128xf32>
    %cst_8 = arith.constant 0.000000e+00 : f32
    %22 = vector.broadcast %cst_8 : f32 to vector<16x128xf32>
    %23 = arith.maximumf %21, %22 : vector<16x128xf32>
    %24 = arith.addf %23, %11 : vector<16x128xf32>
    %cst_9 = arith.constant 0.000000e+00 : f32
    %25 = vector.broadcast %cst_9 : f32 to vector<16x128xf32>
    %26 = arith.subf %25, %24 : vector<16x128xf32>
    %cst_10 = arith.constant 2.000000e+00 : f32
    %27 = vector.broadcast %cst_10 : f32 to vector<16x128xf32>
    %28 = arith.mulf %26, %27 : vector<16x128xf32>
    %29 = math.exp %28 : vector<16x128xf32>
    %30 = arith.mulf %29, %16 : vector<16x128xf32>
    %c0_11 = arith.constant 0 : index
    %c0_12 = arith.constant 0 : index
    %31 = vector.load %arg3[%c0_11, %c0_12] : memref<1x128xf32, #tpu.memory_space<vmem>>, vector<1x128xf32>
    %cst_13 = arith.constant dense<0.000000e+00> : vector<128xf32>
    %32 = vector.multi_reduction <add>, %30, %cst_13 [0] : vector<16x128xf32> to vector<128xf32>
    %33 = vector.shape_cast %32 : vector<128xf32> to vector<1x128xf32>
    %34 = arith.addf %31, %33 : vector<1x128xf32>
    %c0_14 = arith.constant 0 : index
    %c0_15 = arith.constant 0 : index
    %35 = vector.load %arg3[%c0_14, %c0_15] : memref<1x128xf32, #tpu.memory_space<vmem>>, vector<1x128xf32>
    tpu.vector_store %arg3[%c0_14, %c0_15], %34 {strides = array<i32>} : memref<1x128xf32, #tpu.memory_space<vmem>>, vector<1x128xf32>,
    return
  }
  func.func @transform_0(%arg0: i32) -> (i32, i32) {
    %c0_i32 = arith.constant 0 : i32
    %c0_i32_0 = arith.constant 0 : i32
    return %arg0, %c0_i32 : i32, i32
  }
  func.func @transform_1(%arg0: i32) -> (i32, i32) {
    %c0_i32 = arith.constant 0 : i32
    %c0_i32_0 = arith.constant 0 : i32
    return %arg0, %c0_i32 : i32, i32
  }
  func.func @transform_2(%arg0: i32) -> (i32, i32) {
    %c0_i32 = arith.constant 0 : i32
    %c0_i32_0 = arith.constant 0 : i32
    %c0_i32_1 = arith.constant 0 : i32
    return %c0_i32, %c0_i32_0 : i32, i32
  }
}

</mosaic_0001>

<bundles_post_ra>
// kernel: tpu_custom_call.1
= control target key start
LH: loop header
LB: loop body
LE: loop exit
PB: predicated region body
PF: predicated region fallthrough
CT: control target
= control target key end

     0   :  { %7 = vsyncpa [#allocation3], 0  ;;  %s233_s0 = inlined_call_operand.hbm [shape: f32[16,128], index: 0, kind: input, shape index: {}]   ;;  %s234_s1 = inlined_call_operand.hbm [shape: f32[16,128], index: 1, kind: input, shape index: {}]   ;;  %s235_s2 = inlined_call_operand.hbm [shape: f32[1,128], index: 2, kind: output, shape index: {}]  }
   0x1   :  { %8 = vsyncpa [#allocation6], 0 }
   0x2   :  { %9 = vsyncpa [#allocation4], 0  ;;  %s203_s9 = smov [#allocation2]  }
   0x3   :  { %s15_s10 = sshll.u32 %s203_s9, 4  ;;  %s16_s10 = int_to_ptr.vmem [resolvable:$true] %s15_s10 }
   0x4   :  { %s145_s11 = scalar_lea.vmem %s16_s10, 256  ;;  %p150_p1 = scmp.lt.s32.totalorder %s16_s10, %s16_s10 }
   0x5   :  { %p146_p0 = scmp.ne.s32.totalorder %s16_s10, %s145_s11  ;;  %p151_p2 = scmp.lt.s32.totalorder %s145_s11, %s145_s11 }
   0x7   :  { %p152_p3 = por %p151_p2, %p150_p1 }
   0x9   :  { %p153_p4 = pnand %p152_p3, %p146_p0 }
   0xb   :  { %156 = shalt.err (!%p153_p4)
}
   0xc   :  { %s204_s12 = smov 128   ;;  %s205_s13 = smov 8  }
   0xd   :  { %21 = dma.hbm_to_vmem [thread:$0]  %s233_s0, 256, %s16_s10, [#allocation3], %s204_s12, %s204_s12, %s205_s13  }
   0xe   :  { %s206_s16 = smov [#allocation5]  }
   0xf   :  { %s27_s17 = sshll.u32 %s206_s16, 4  ;;  %s28_s17 = int_to_ptr.vmem [resolvable:$true] %s27_s17 }
  0x10   :  { %s165_s18 = scalar_lea.vmem %s28_s17, 256  ;;  %p170_p6 = scmp.lt.s32.totalorder %s28_s17, %s28_s17 }
  0x11   :  { %p166_p5 = scmp.ne.s32.totalorder %s28_s17, %s165_s18  ;;  %p171_p7 = scmp.lt.s32.totalorder %s165_s18, %s165_s18 }
  0x13   :  { %p172_p8 = por %p171_p7, %p170_p6 }
  0x15   :  { %p173_p9 = pnand %p172_p8, %p166_p5 }
  0x17   :  { %176 = shalt.err (!%p173_p9)
}
  0x18   :  { %33 = dma.hbm_to_vmem [thread:$0]  %s234_s1, 256, %s28_s17, [#allocation6], %s204_s12, %s204_s12, %s205_s13  }
  0x19   :  { %197 = dma.done.wait [#allocation3], 256  }
  0x1a   :  { %198 = vsyncadd [#allocation3], 4294967040 }
  0x1b   :  { %199 = dma.done.wait [#allocation6], 256  }
  0x1c   :  { %200 = vsyncadd [#allocation6], 4294967040  ;;  %v207_v0 = vmov 0.0   ;;  %v45_v1 = vld [vmem:[#allocation2] sm:$0xff]  ;;  %v46_v2 = vld [vmem:[#allocation2 + $0x8] sm:$0xff]  ;;  %s208_s0 = smov [#allocation7]  }
  0x1d   :  { %44 = vst [vmem:[#allocation7] sm:$0x1] %v207_v0  ;;  %v49_v3 = vand.u32 2147483647, %v45_v1  ;;  %v50_v4 = vand.u32 2147483647, %v46_v2 }
  0x1e   :  { %v47_v10 = vld [vmem:[#allocation5] sm:$0xff]  ;;  %v48_v12 = vld [vmem:[#allocation5 + $0x8] sm:$0xff]  ;;  %v63_v35 = vmax.f32 %v45_v1, 0.0  ;;  %v64_v37 = vmax.f32 %v46_v2, 0.0  ;;  %s107_s1 = sshll.u32 %s208_s0, 4  ;;  %s108_s1 = int_to_ptr.vmem [resolvable:$true] %s107_s1 }
  0x1f   :  { %v51_v5 = vsub.f32 0.0, %v49_v3  ;;  %v52_v6 = vsub.f32 0.0, %v50_v4  ;;  %v71_v15 = vmul.f32 2.0, %v47_v10  ;;  %v72_v16 = vmul.f32 2.0, %v48_v12  ;;  %s177_s21 = scalar_lea.vmem %s108_s1, 16  ;;  %s181_s22 = scalar_lea.vmem %s108_s1, 32 }
  0x20   :  { %v65_v36 = vmul.f32 %v47_v10, %v45_v1  ;;  %v66_v38 = vmul.f32 %v48_v12, %v46_v2  ;;  %p178_p10 = scmp.ne.s32.totalorder %s108_s1, %s177_s21  ;;  %p182_p11 = scmp.lt.s32.totalorder %s108_s1, %s108_s1 }
  0x21   :  { %v53_v7 = vmul.f32 1.442695, %v51_v5  ;;  %v55_v8 = vmul.f32 1.442695, %v52_v6  ;;  %v117_v17 = vadd.f32 -1.0, %v71_v15  ;;  %v118_v18 = vadd.f32 -1.0, %v72_v16  ;;  %p183_p12 = scmp.lt.s32.totalorder %s181_s22, %s177_s21 }
  0x22   :  { %v67_v39 = vsub.f32 %v63_v35, %v65_v36  ;;  %v68_v40 = vsub.f32 %v64_v37, %v66_v38 }
  0x23   :  { %125 = vpow2.f32 %v53_v7  ;;  %v75_v19 = vmul.f32 %v117_v17, %v45_v1  ;;  %v76_v20 = vmul.f32 %v118_v18, %v46_v2  ;;  %p184_p13 = por %p183_p12, %p182_p11 }
  0x24   :  { %127 = vpow2.f32 %v55_v8  ;;  %v91_v53 = vld [vmem:[#allocation7] sm:$0x1] }
  0x25   :  { %v77_v21 = vmax.f32 %v75_v19, 0.0  ;;  %v78_v23 = vmax.f32 %v76_v20, 0.0  ;;  %p185_p0 = pnand %p184_p13, %p178_p10 }
  0x30   :  { %v126_v9 = vpop.eup %125 }
  0x31   :  { %v128_v11 = vpop.eup %127  ;;  %v57_v13 = vadd.f32 1.0, %v126_v9 }
  0x32   :  { %v58_v14 = vadd.f32 1.0, %v128_v11 }
  0x33   :  { %129 = vlog2.f32 %v57_v13 }
  0x34   :  { %131 = vlog2.f32 %v58_v14 }
  0x40   :  { %v130_v22 = vpop.eup %129 }
  0x41   :  { %v132_v24 = vpop.eup %131  ;;  %v60_v25 = vmul.f32 0.6931472, %v130_v22 }
  0x42   :  { %v62_v26 = vmul.f32 0.6931472, %v132_v24 }
  0x43   :  { %v79_v27 = vadd.f32 %v77_v21, %v60_v25  ;;  %v69_v41 = vadd.f32 %v67_v39, %v60_v25 }
  0x44   :  { %v80_v28 = vadd.f32 %v78_v23, %v62_v26  ;;  %v70_v42 = vadd.f32 %v68_v40, %v62_v26 }
  0x45   :  { %v81_v29 = vsub.f32 0.0, %v79_v27 }
  0x46   :  { %v82_v30 = vsub.f32 0.0, %v80_v28 }
  0x47   :  { %v83_v31 = vmul.f32 2.0, %v81_v29 }
  0x48   :  { %v84_v32 = vmul.f32 2.0, %v82_v30 }
  0x49   :  { %v85_v33 = vmul.f32 1.442695, %v83_v31 }
  0x4a   :  { %v87_v34 = vmul.f32 1.442695, %v84_v32 }
  0x4b   :  { %133 = vpow2.f32 %v85_v33 }
  0x4c   :  { %135 = vpow2.f32 %v87_v34 }
  0x58   :  { %v134_v43 = vpop.eup %133 }
  0x59   :  { %v136_v44 = vpop.eup %135  ;;  %v89_v45 = vmul.f32 %v134_v43, %v69_v41 }
  0x5a   :  { %v90_v46 = vmul.f32 %v136_v44, %v70_v42 }
  0x5c   :  { %v92_v47 = vadd.f32 %v90_v46, %v89_v45 }
  0x5e   :  { %v93_v48 = vrot.slane %v92_v47, 4 }
  0x60   :  { %v94_v49 = vadd.f32 %v93_v48, %v92_v47 }
  0x62   :  { %v95_v50 = vrot.slane %v94_v49, 2 }
  0x64   :  { %v96_v51 = vadd.f32 %v95_v50, %v94_v49 }
  0x66   :  { %v97_v52 = vrot.slane %v96_v51, 1 }
  0x68   :  { %v98_v54 = vadd.f32 %v97_v52, %v96_v51 }
  0x6a   :  { %v99_v55 = vadd.f32 %v98_v54, %v91_v53 }
  0x6c   :  { %100 = vst [vmem:[#allocation7] sm:$0x1] %v99_v55 }
  0x6d   :  { %188 = shalt.err (!%p185_p0)
}
  0x6e   :  { %110 = dma.vmem_to_hbm [thread:$0]  %s108_s1, 16, %s235_s2, [#allocation4]  }
  0x6f   :  { %201 = dma.done.wait [#allocation4], 16  }
  0x70   :  { %202 = vsyncadd [#allocation4], 4294967280 }
  0x71   :  { %114 = vsyncpa [#allocation3], 1 }
  0x72   :  { %115 = vsyncpa [#allocation6], 1 }
  0x73   :  { %116 = vsyncpa [#allocation4], 1 }

</bundles_post_ra>
